<compile_context>
chip_gen: v6e
topology: v6e:2x2x1
jax: 0.10.0
libtpu: 0.0.40
codegen_flags: <defaults>
</compile_context>

<pallas_src>
import functools

import jax
import jax.numpy as jnp
from jax import lax
from jax.experimental import pallas as pl
from jax.experimental.pallas import tpu as pltpu

LN_EPS = 1e-5  # torch.nn.LayerNorm default


def _round_up(x, m):
    return (x + m - 1) // m * m


def _vmem_budget_bytes():
    """Generation-aware VMEM budget: ~75% of physical capacity, conservative fallback."""
    cap = None
    try:
        cap = getattr(pltpu.get_tpu_info(), "vmem_capacity_bytes", None)
    except Exception:
        cap = None
    if not cap:
        cap = 64 * 1024 * 1024  # conservative: v7x physical VMEM
    return int(cap) * 3 // 4


def _choose_tm(m_rows, k_pad, e_pad, out_itemsize, budget):
    """Row tile TM: multiple of 8, VMEM-feasible, keeps >= ~8 grid steps, and (when
    possible) an exact divisor of m_rows so no row padding / post-kernel slice."""
    resident = k_pad * e_pad * 2 + 8 * e_pad * 4   # bf16 weight + sublane-padded (3,E) params
    m8 = _round_up(m_rows, 8)
    tm = min(1024, max(256, _round_up((m_rows + 7) // 8, 8)), m8)
    tm = max(8, _round_up(tm, 8))

    def fits(t):
        per_tile = t * k_pad * 2 + t * e_pad * out_itemsize   # bf16 in tile + out tile
        scratch = 2 * t * e_pad * 4                           # f32 y / temporaries
        return 2 * per_tile + scratch + resident <= budget    # 2x: double buffering

    while tm > 8 and not fits(tm):
        tm = max(8, _round_up(tm // 2, 8))

    # Snap to a divisor of m_rows (within 2x) to avoid padding M entirely.
    lo = max(8, tm // 2)
    for cand in range(tm, lo - 1, -8):
        if m_rows % cand == 0:
            return cand
    return tm


def _patch_embed_kernel(x_ref, w_ref, p_ref, o_ref, *, e_valid):
    # x_ref: [TM, K_pad]    bf16 flattened-patch tile (padded K cols are zero)
    # w_ref: [K_pad, E_pad] bf16 weight, resident     (padded rows/cols are zero)
    # p_ref: [3, E_pad]     f32: row0 = linear bias, row1 = LN gamma, row2 = LN beta
    #                       (padded columns are zero)
    # o_ref: [TM, E_pad]    output tile (out dtype)
    y = jnp.dot(x_ref[...], w_ref[...], preferred_element_type=jnp.float32)
    y = y + p_ref[0:1, :]

    inv_e = 1.0 / float(e_valid)
    # Padded columns of y are exact zeros (zero weight cols & zero bias), so these
    # full-width sums equal the sums over the valid columns; no mask needed.
    mean = jnp.sum(y, axis=-1, keepdims=True) * inv_e
    ex2 = jnp.sum(y * y, axis=-1, keepdims=True) * inv_e
    var = jnp.maximum(ex2 - mean * mean, 0.0)   # guard tiny negatives from cancellation
    normed = (y - mean) * lax.rsqrt(var + LN_EPS)
    # Padded columns: gamma = beta = 0 there, so padded outputs stay exactly zero.
    o_ref[...] = (normed * p_ref[1:2, :] + p_ref[2:3, :]).astype(o_ref.dtype)


def patch_embedding_forward(x, weight, bias, gamma, beta, *, patch_size,
                            out_dtype=jnp.bfloat16):
    """x: [B, C, H, W] float32 (NCHW, as in PyTorch).  weight: [patch_dim, E]
    (transposed torch nn.Linear weight, rows ordered (p1, p2, c)).
    Returns [B, num_patches, E] in `out_dtype`.

    NOTE: matmul operands are cast to bf16 with f32 accumulation — a slight
    deviation from torch's fp32 nn.Linear (abs err ~1e-2 for unit-scale data)."""
    B, C, H, W = x.shape
    p1 = p2 = patch_size
    assert H % p1 == 0 and W % p2 == 0, "Image dims must be divisible by patch size."
    h, w = H // p1, W // p2
    num_patches = h * w
    patch_dim = C * p1 * p2
    assert weight.shape[0] == patch_dim
    E = weight.shape[1]

    # Rearrange 'b c (h p1) (w p2) -> b (h w) (p1 p2 c)' + bf16 cast + pads, as one
    # fused XLA op.  TODO(synk): fuse this gather into the kernel (see header).
    xr = x.reshape(B, C, h, p1, w, p2)
    xr = jnp.transpose(xr, (0, 2, 4, 3, 5, 1))                 # b, h, w, p1, p2, c
    patches = xr.reshape(B * num_patches, patch_dim).astype(jnp.bfloat16)

    M = B * num_patches
    E_pad = _round_up(E, 128) if E % 128 else E            # pad only when needed
    K_pad = _round_up(patch_dim, 128) if patch_dim % 128 else patch_dim

    budget = _vmem_budget_bytes()
    out_itemsize = jnp.dtype(out_dtype).itemsize
    tm = _choose_tm(M, K_pad, E_pad, out_itemsize, budget)
    M_pad = _round_up(M, tm)
    grid_m = M_pad // tm

    pad_m, pad_k, pad_e = M_pad - M, K_pad - patch_dim, E_pad - E
    if pad_m or pad_k:
        patches = jnp.pad(patches, ((0, pad_m), (0, pad_k)))

    w_b = weight.astype(jnp.bfloat16)
    params = jnp.stack([bias, gamma, beta]).astype(jnp.float32)    # (3, E)
    if pad_k:
        w_b = jnp.pad(w_b, ((0, pad_k), (0, 0)))
    if pad_e:
        w_b = jnp.pad(w_b, ((0, 0), (0, pad_e)))
        params = jnp.pad(params, ((0, 0), (0, pad_e)))

    kernel = functools.partial(_patch_embed_kernel, e_valid=E)

    out = pl.pallas_call(
        kernel,
        out_shape=jax.ShapeDtypeStruct((M_pad, E_pad), out_dtype),
        grid_spec=pltpu.PrefetchScalarGridSpec(
            num_scalar_prefetch=0,
            grid=(grid_m,),
            in_specs=[
                pl.BlockSpec((tm, K_pad), lambda i: (i, 0)),       # patch tile
                pl.BlockSpec((K_pad, E_pad), lambda i: (0, 0)),    # resident weight
                pl.BlockSpec((3, E_pad), lambda i: (0, 0)),        # bias/gamma/beta
            ],
            out_specs=pl.BlockSpec((tm, E_pad), lambda i: (i, 0)),
        ),
        compiler_params=pltpu.CompilerParams(
            # TODO(synk): confirm this splits across both v7x TensorCores; if not,
            # use pltpu.CORE_PARALLEL (or pl.core_map over a tensorcore mesh).
            dimension_semantics=("parallel",),
            vmem_limit_bytes=budget,
        ),
    )(patches, w_b, params)

    if pad_m or pad_e:
        out = out[:M, :E]
    return out.reshape(B, num_patches, E)


if __name__ == "__main__":
    # Small ViT-style config: image 16x16, patch 4, channels 4, embed 32
    B, C, H, W = 2, 4, 16, 16
    patch_size = 4
    embed_dim = 32
    patch_dim = C * patch_size * patch_size  # 64

    key = jax.random.PRNGKey(0)
    kx, kw, kb = jax.random.split(key, 3)

    x = jax.random.normal(kx, (B, C, H, W), dtype=jnp.float32)
    # torch nn.Linear weight is [E, P]; we store the transposed [P, E]
    weight = jax.random.normal(kw, (patch_dim, embed_dim), dtype=jnp.float32) * 0.02
    bias = jax.random.normal(kb, (embed_dim,), dtype=jnp.float32) * 0.02
    gamma = jnp.ones((embed_dim,), dtype=jnp.float32)   # nn.LayerNorm defaults
    beta = jnp.zeros((embed_dim,), dtype=jnp.float32)

    out32 = patch_embedding_forward(x, weight, bias, gamma, beta,
                                    patch_size=patch_size, out_dtype=jnp.float32)
    out16 = patch_embedding_forward(x, weight, bias, gamma, beta,
                                    patch_size=patch_size)   # default bf16 output
    out32, out16 = jax.block_until_ready((out32, out16))

    # Pure-JAX reference (bf16 matmul operands + f32 accumulation, matching the kernel)
    h, w = H // patch_size, W // patch_size
    xr = x.reshape(B, C, h, patch_size, w, patch_size)
    xr = jnp.transpose(xr, (0, 2, 4, 3, 5, 1)).reshape(B, h * w, patch_dim)
    y_ref = jnp.dot(xr.astype(jnp.bfloat16), weight.astype(jnp.bfloat16),
                    preferred_element_type=jnp.float32) + bias
    mu = y_ref.mean(-1, keepdims=True)
    var = ((y_ref - mu) ** 2).mean(-1, keepdims=True)
    ref = (y_ref - mu) / jnp.sqrt(var + LN_EPS) * gamma + beta

    assert out32.shape == (B, h * w, embed_dim)
    assert out16.shape == (B, h * w, embed_dim) and out16.dtype == jnp.bfloat16
    err32 = jnp.max(jnp.abs(out32 - ref))
    err16 = jnp.max(jnp.abs(out16.astype(jnp.float32) - ref))
    assert err32 < 1e-2, f"f32 max abs err {err32}"
    assert err16 < 3e-2, f"bf16 max abs err {err16}"

    print("KERNEL_OK")
</pallas_src>

<mosaic_0001>
module attributes {stable_mosaic.version = 11 : i64} {
  func.func @_patch_embed_kernel(%arg0: i32, %arg1: memref<32x128xbf16, #tpu.memory_space<vmem>>, %arg2: memref<128x128xbf16, #tpu.memory_space<vmem>>, %arg3: memref<3x128xf32, #tpu.memory_space<vmem>>, %arg4: memref<32x128xf32, #tpu.memory_space<vmem>>) attributes {dimension_semantics = [#tpu.dimension_semantics<parallel>], iteration_bounds = array<i64: 1>, scalar_prefetch = 0 : i64, scratch_operands = 0 : i64, tpu.core_type = #tpu.core_type<tc>, window_params = [{transform_indices = @transform_0, window_bounds = array<i64: 32, 128>}, {pipeline_mode = #tpu.pipeline_mode<synchronous>, transform_indices = @transform_1, window_bounds = array<i64: 128, 128>}, {pipeline_mode = #tpu.pipeline_mode<synchronous>, transform_indices = @transform_2, window_bounds = array<i64: 3, 128>}, {transform_indices = @transform_3, window_bounds = array<i64: 32, 128>}]} {
    %c0 = arith.constant 0 : index
    %c0_0 = arith.constant 0 : index
    %0 = vector.load %arg1[%c0, %c0_0] : memref<32x128xbf16, #tpu.memory_space<vmem>>, vector<32x128xbf16>
    %c0_1 = arith.constant 0 : index
    %c0_2 = arith.constant 0 : index
    %1 = vector.load %arg2[%c0_1, %c0_2] : memref<128x128xbf16, #tpu.memory_space<vmem>>, vector<128x128xbf16>
    %cst = arith.constant dense<0.000000e+00> : vector<32x128xf32>
    %2 = tpu.matmul %0, %1, %cst {dimension_numbers = #tpu.dot_dimension_numbers<[1], [0], [0], [1], [0, 0, 1, 1], [], []>} : vector<32x128xbf16>, vector<128x128xbf16>, vector<32x128xf32> -> vector<32x128xf32>
    %c0_3 = arith.constant 0 : index
    %c0_4 = arith.constant 0 : index
    %3 = vector.load %arg3[%c0_3, %c0_4] : memref<3x128xf32, #tpu.memory_space<vmem>>, vector<1x128xf32>
    %4 = vector.broadcast %3 : vector<1x128xf32> to vector<32x128xf32>
    %5 = arith.addf %2, %4 : vector<32x128xf32>
    %cst_5 = arith.constant dense<0.000000e+00> : vector<32xf32>
    %6 = vector.multi_reduction <add>, %5, %cst_5 [1] : vector<32x128xf32> to vector<32xf32>
    %7 = vector.shape_cast %6 : vector<32xf32> to vector<32x1xf32>
    %cst_6 = arith.constant 3.125000e-02 : f32
    %8 = vector.broadcast %cst_6 : f32 to vector<32x1xf32>
    %9 = arith.mulf %7, %8 : vector<32x1xf32>
    %10 = arith.mulf %5, %5 : vector<32x128xf32>
    %cst_7 = arith.constant dense<0.000000e+00> : vector<32xf32>
    %11 = vector.multi_reduction <add>, %10, %cst_7 [1] : vector<32x128xf32> to vector<32xf32>
    %12 = vector.shape_cast %11 : vector<32xf32> to vector<32x1xf32>
    %cst_8 = arith.constant 3.125000e-02 : f32
    %13 = vector.broadcast %cst_8 : f32 to vector<32x1xf32>
    %14 = arith.mulf %12, %13 : vector<32x1xf32>
    %15 = arith.mulf %9, %9 : vector<32x1xf32>
    %16 = arith.subf %14, %15 : vector<32x1xf32>
    %cst_9 = arith.constant 0.000000e+00 : f32
    %17 = vector.broadcast %cst_9 : f32 to vector<32x1xf32>
    %18 = arith.maximumf %16, %17 : vector<32x1xf32>
    %19 = vector.broadcast %9 : vector<32x1xf32> to vector<32x128xf32>
    %20 = arith.subf %5, %19 : vector<32x128xf32>
    %cst_10 = arith.constant 9.99999974E-6 : f32
    %21 = vector.broadcast %cst_10 : f32 to vector<32x1xf32>
    %22 = arith.addf %18, %21 : vector<32x1xf32>
    %23 = math.rsqrt %22 : vector<32x1xf32>
    %24 = vector.broadcast %23 : vector<32x1xf32> to vector<32x128xf32>
    %25 = arith.mulf %20, %24 : vector<32x128xf32>
    %c1 = arith.constant 1 : index
    %c0_11 = arith.constant 0 : index
    %26 = vector.load %arg3[%c1, %c0_11] : memref<3x128xf32, #tpu.memory_space<vmem>>, vector<1x128xf32>
    %27 = vector.broadcast %26 : vector<1x128xf32> to vector<32x128xf32>
    %28 = arith.mulf %25, %27 : vector<32x128xf32>
    %c2 = arith.constant 2 : index
    %c0_12 = arith.constant 0 : index
    %29 = vector.load %arg3[%c2, %c0_12] : memref<3x128xf32, #tpu.memory_space<vmem>>, vector<1x128xf32>
    %30 = vector.broadcast %29 : vector<1x128xf32> to vector<32x128xf32>
    %31 = arith.addf %28, %30 : vector<32x128xf32>
    %c0_13 = arith.constant 0 : index
    %c0_14 = arith.constant 0 : index
    %32 = vector.load %arg4[%c0_13, %c0_14] : memref<32x128xf32, #tpu.memory_space<vmem>>, vector<32x128xf32>
    tpu.vector_store %arg4[%c0_13, %c0_14], %31 {strides = array<i32>} : memref<32x128xf32, #tpu.memory_space<vmem>>, vector<32x128xf32>,
    return
  }
  func.func @transform_0(%arg0: i32) -> (i32, i32) {
    %c0_i32 = arith.constant 0 : i32
    %c0_i32_0 = arith.constant 0 : i32
    return %arg0, %c0_i32 : i32, i32
  }
  func.func @transform_1(%arg0: i32) -> (i32, i32) {
    %c0_i32 = arith.constant 0 : i32
    %c0_i32_0 = arith.constant 0 : i32
    %c0_i32_1 = arith.constant 0 : i32
    return %c0_i32, %c0_i32_0 : i32, i32
  }
  func.func @transform_2(%arg0: i32) -> (i32, i32) {
    %c0_i32 = arith.constant 0 : i32
    %c0_i32_0 = arith.constant 0 : i32
    %c0_i32_1 = arith.constant 0 : i32
    return %c0_i32, %c0_i32_0 : i32, i32
  }
  func.func @transform_3(%arg0: i32) -> (i32, i32) {
    %c0_i32 = arith.constant 0 : i32
    %c0_i32_0 = arith.constant 0 : i32
    return %arg0, %c0_i32 : i32, i32
  }
}

</mosaic_0001>

<bundles_post_ra>
// kernel: tpu_custom_call.1
= control target key start
LH: loop header
LB: loop body
LE: loop exit
PB: predicated region body
PF: predicated region fallthrough
CT: control target
= control target key end

     0   :  { %8 = vsyncpa [#allocation3], 0  ;;  %s492_s0 = inlined_call_operand.hbm [shape: bf16[32,128], index: 0, kind: input, shape index: {}]   ;;  %s493_s1 = inlined_call_operand.hbm [shape: bf16[128,128], index: 1, kind: input, shape index: {}]   ;;  %s494_s2 = inlined_call_operand.hbm [shape: f32[3,128], index: 2, kind: input, shape index: {}]   ;;  %s495_s3 = inlined_call_operand.hbm [shape: f32[32,128], index: 3, kind: output, shape index: {}]  }
   0x1   :  { %9 = vsyncpa [#allocation6], 0 }
   0x2   :  { %10 = vsyncpa [#allocation4], 0  ;;  %s440_s12 = smov [#allocation5]   ;;  %s441_s14 = smov [#allocation2]  }
   0x3   :  { %s28_s13 = sshll.u32 %s440_s12, 4  ;;  %s16_s15 = sshll.u32 %s441_s14, 4  ;;  %s29_s13 = int_to_ptr.vmem [resolvable:$true] %s28_s13  ;;  %s17_s15 = int_to_ptr.vmem [resolvable:$true] %s16_s15 }
   0x4   :  { %s362_s16 = scalar_lea.vmem %s29_s13, 1024  ;;  %p367_p1 = scmp.lt.s32.totalorder %s29_s13, %s29_s13 }
   0x5   :  { %p363_p0 = scmp.ne.s32.totalorder %s29_s13, %s362_s16  ;;  %p368_p2 = scmp.lt.s32.totalorder %s362_s16, %s362_s16 }
   0x7   :  { %p369_p3 = por %p368_p2, %p367_p1 }
   0x9   :  { %p370_p4 = pnand %p369_p3, %p363_p0 }
   0xb   :  { %373 = shalt.err (!%p370_p4)
}
   0xc   :  { %s442_s17 = smov 64   ;;  %s443_s18 = smov 4  }
   0xd   :  { %34 = dma.hbm_to_vmem [thread:$0]  %s493_s1, 1024, %s29_s13, [#allocation6], %s442_s17, %s442_s17, %s443_s18  }
   0xe   :  { %s382_s21 = scalar_lea.vmem %s17_s15, 256  ;;  %p387_p6 = scmp.lt.s32.totalorder %s17_s15, %s17_s15 }
   0xf   :  { %p383_p5 = scmp.ne.s32.totalorder %s17_s15, %s382_s21  ;;  %p388_p7 = scmp.lt.s32.totalorder %s382_s21, %s382_s21 }
  0x11   :  { %p389_p8 = por %p388_p7, %p387_p6 }
  0x13   :  { %p390_p9 = pnand %p389_p8, %p383_p5 }
  0x15   :  { %393 = shalt.err (!%p390_p9)
}
  0x16   :  { %22 = dma.hbm_to_vmem [thread:$0]  %s492_s0, 256, %s17_s15, [#allocation3], %s442_s17, %s442_s17, %s443_s18  }
  0x17   :  { %s444_s24 = smov [#allocation7]  }
  0x18   :  { %s41_s25 = sshll.u32 %s444_s24, 4  ;;  %s42_s25 = int_to_ptr.vmem [resolvable:$true] %s41_s25 }
  0x19   :  { %s402_s26 = scalar_lea.vmem %s42_s25, 64  ;;  %p407_p11 = scmp.lt.s32.totalorder %s42_s25, %s42_s25 }
  0x1a   :  { %p403_p10 = scmp.ne.s32.totalorder %s42_s25, %s402_s26  ;;  %p408_p12 = scmp.lt.s32.totalorder %s402_s26, %s402_s26 }
  0x1c   :  { %p409_p13 = por %p408_p12, %p407_p11 }
  0x1e   :  { %p410_p0 = pnand %p409_p13, %p403_p10 }
  0x20   :  { %413 = shalt.err (!%p410_p0)
}
  0x21   :  { %44 = dma.hbm_to_vmem [thread:$0]  %s494_s2, 64, %s42_s25, [#allocation6]  }
  0x22   :  { %434 = dma.done.wait [#allocation3], 256  }
  0x23   :  { %435 = vsyncadd [#allocation3], 4294967040 }
  0x24   :  { %436 = dma.done.wait [#allocation6], 1088  }
  0x25   :  { %437 = vsyncadd [#allocation6], 4294966208  ;;  %v336_v0 = vld [vmem:[#allocation5 + $0x38] sm:$0xff]   ;;  %v337_v1 = vld [vmem:[#allocation5 + $0x30] sm:$0xff]   ;;  %s445_s0 = smov [#allocation8]  }
  0x26   :  { %308 = vmatprep.subr.bf16.mxu0 %v336_v0  ;;  %v338_v2 = vld [vmem:[#allocation5 + $0x28] sm:$0xff]   ;;  %v339_v3 = vld [vmem:[#allocation5 + $0x20] sm:$0xff]   ;;  %v344_v4 = vld [vmem:[#allocation2] sm:$0xff]   ;;  %s272_s2 = sshll.u32 %s445_s0, 4  ;;  %s273_s2 = int_to_ptr.vmem [resolvable:$true] %s272_s2 }
  0x27   :  { %309 = vmatpush3.bf16.msra.mxu0 %v336_v0  ;;  %324 = vmatprep.mubr.bf16.mxu0 %v344_v4  ;;  %v340_v5 = vld [vmem:[#allocation5 + $0x18] sm:$0xff]   ;;  %v341_v6 = vld [vmem:[#allocation5 + $0x10] sm:$0xff]   ;;  %v342_v7 = vld [vmem:[#allocation5 + $0x8] sm:$0xff]   ;;  %s414_s28 = scalar_lea.vmem %s273_s2, 512  ;;  %p419_p2 = scmp.lt.s32.totalorder %s273_s2, %s273_s2 }
  0x28   :  { %310 = vmatprep.subr.bf16.mxu0 %v337_v1  ;;  %v343_v8 = vld [vmem:[#allocation5] sm:$0xff]   ;;  %v345_v9 = vld [vmem:[#allocation2 + $0x8] sm:$0xff]   ;;  %p415_p1 = scmp.ne.s32.totalorder %s273_s2, %s414_s28  ;;  %p420_p3 = scmp.lt.s32.totalorder %s414_s28, %s414_s28 }
  0x29   :  { %v285_v10 = vld [vmem:[#allocation7] ss:$0 sm:$0xff]  ;;  %v296_v57 = vld [vmem:[#allocation7 + $0x1] ss:$0 sm:$0xff]  ;;  %v297_v59 = vld [vmem:[#allocation7 + $0x2] ss:$0 sm:$0xff] }
  0x2a   :  { %p421_p4 = por %p420_p3, %p419_p2 }
  0x2b   :  { %311 = vmatpush3.bf16.msra.mxu0 %v337_v1 }
  0x2c   :  { %312 = vmatprep.subr.bf16.mxu0 %v338_v2  ;;  %p422_p5 = pnand %p421_p4, %p415_p1 }
  0x2f   :  { %313 = vmatpush3.bf16.msra.mxu0 %v338_v2 }
  0x30   :  { %314 = vmatprep.subr.bf16.mxu0 %v339_v3 }
  0x33   :  { %315 = vmatpush3.bf16.msra.mxu0 %v339_v3 }
  0x34   :  { %316 = vmatprep.subr.bf16.mxu0 %v340_v5 }
  0x37   :  { %317 = vmatpush3.bf16.msra.mxu0 %v340_v5 }
  0x38   :  { %318 = vmatprep.subr.bf16.mxu0 %v341_v6 }
  0x3b   :  { %319 = vmatpush3.bf16.msra.mxu0 %v341_v6 }
  0x3c   :  { %320 = vmatprep.subr.bf16.mxu0 %v342_v7 }
  0x3f   :  { %321 = vmatpush3.bf16.msra.mxu0 %v342_v7 }
  0x40   :  { %322 = vmatprep.subr.bf16.mxu0 %v343_v8 }
  0x43   :  { %323 = vmatpush3.bf16.msra.mxu0 %v343_v8 }
  0x46   :  { %325 = vmatmul.mubr.bf16.vlgmr.msra.gmra.mxu0 %v345_v9 }
 0x106   :  { %v326_v11 = vpop.f32.mrf.mxu0 }
 0x107   :  { %v477_v12 = vadd.f32 %v326_v11, %v285_v10 }
 0x108   :  { %v174_v13 = vpop.f32.mrf.mxu0 }
 0x109   :  { %v175_v14 = vadd.f32 %v285_v10, %v174_v13  ;;  %193 = vadd.xlane.f32.xlu1 %v477_v12  ;;  %v203_v22 = vmul.f32 %v477_v12, %v477_v12 }
 0x10a   :  { %v327_v15 = vpop.f32.mrf.mxu0 }
 0x10b   :  { %v480_v16 = vadd.f32 %v327_v15, %v285_v10  ;;  %189 = vadd.xlane.f32.xlu0 %v175_v14  ;;  %v201_v19 = vmul.f32 %v175_v14, %v175_v14 }
 0x10c   :  { %v177_v17 = vpop.f32.mrf.mxu0 }
 0x10d   :  { %v178_v18 = vadd.f32 %v285_v10, %v177_v17  ;;  %195 = vadd.xlane.f32.xlu1 %v480_v16  ;;  %v204_v21 = vmul.f32 %v480_v16, %v480_v16 }
 0x10f   :  { %205 = vadd.xlane.f32.xlu0 %v201_v19  ;;  %v202_v20 = vmul.f32 %v178_v18, %v178_v18 }
 0x111   :  { %207 = vadd.xlane.f32.xlu1 %v202_v20 }
 0x113   :  { %191 = vadd.xlane.f32.xlu0 %v178_v18 }
 0x115   :  { %211 = vadd.xlane.f32.xlu1 %v204_v21 }
 0x117   :  { %209 = vadd.xlane.f32.xlu0 %v203_v22 }
 0x192   :  { %v194_v23 = vpop.xlane.xlu1 %193 }
 0x193   :  { %v199_v33 = vmul.f32 0.03125, %v194_v23 }
 0x194   :  { %v190_v24 = vpop.xlane.xlu0 %189 }
 0x195   :  { %v197_v25 = vmul.f32 0.03125, %v190_v24  ;;  %v219_v43 = vmul.f32 %v199_v33, %v199_v33  ;;  %v231_v2 = vsub.f32 %v477_v12, %v199_v33 }
 0x196   :  { %v196_v26 = vpop.xlane.xlu1 %195 }
 0x197   :  { %v217_v28 = vmul.f32 %v197_v25, %v197_v25  ;;  %v200_v30 = vmul.f32 0.03125, %v196_v26  ;;  %v229_v55 = vsub.f32 %v175_v14, %v197_v25 }
 0x198   :  { %v206_v27 = vpop.xlane.xlu0 %205 }
 0x199   :  { %v213_v29 = vmul.f32 0.03125, %v206_v27  ;;  %v220_v37 = vmul.f32 %v200_v30, %v200_v30  ;;  %v232_v0 = vsub.f32 %v480_v16, %v200_v30 }
 0x19a   :  { %v208_v31 = vpop.xlane.xlu1 %207 }
 0x19b   :  { %v221_v32 = vsub.f32 %v213_v29, %v217_v28  ;;  %v214_v40 = vmul.f32 0.03125, %v208_v31 }
 0x19c   :  { %v192_v34 = vpop.xlane.xlu0 %191 }
 0x19d   :  { %v225_v35 = vmax.f32 %v221_v32, 0.0  ;;  %v198_v36 = vmul.f32 0.03125, %v192_v34 }
 0x19e   :  { %v212_v38 = vpop.xlane.xlu1 %211 }
 0x19f   :  { %v233_v39 = vadd.f32 1e-05, %v225_v35  ;;  %v218_v41 = vmul.f32 %v198_v36, %v198_v36  ;;  %v216_v42 = vmul.f32 0.03125, %v212_v38  ;;  %v230_v62 = vsub.f32 %v178_v18, %v198_v36 }
 0x1a0   :  { %v210_v44 = vpop.xlane.xlu0 %209 }
 0x1a1   :  { %346 = vrsqrt.f32 %v233_v39  ;;  %v222_v45 = vsub.f32 %v214_v40, %v218_v41  ;;  %v224_v46 = vsub.f32 %v216_v42, %v220_v37  ;;  %v215_v47 = vmul.f32 0.03125, %v210_v44 }
 0x1a3   :  { %v226_v48 = vmax.f32 %v222_v45, 0.0  ;;  %v228_v49 = vmax.f32 %v224_v46, 0.0  ;;  %v223_v50 = vsub.f32 %v215_v47, %v219_v43 }
 0x1a5   :  { %v234_v51 = vadd.f32 1e-05, %v226_v48  ;;  %v236_v52 = vadd.f32 1e-05, %v228_v49  ;;  %v227_v53 = vmax.f32 %v223_v50, 0.0 }
 0x1a7   :  { %348 = vrsqrt.f32 %v234_v51  ;;  %v235_v54 = vadd.f32 1e-05, %v227_v53 }
 0x1a8   :  { %350 = vrsqrt.f32 %v236_v52 }
 0x1a9   :  { %352 = vrsqrt.f32 %v235_v54 }
 0x1ae   :  { %v347_v56 = vpop.eup %346 }
 0x1af   :  { %v241_v58 = vmul.f32 %v347_v56, %v229_v55 }
 0x1b1   :  { %v250_v60 = vmul.f32 %v296_v57, %v241_v58 }
 0x1b3   :  { %v259_v61 = vadd.f32 %v297_v59, %v250_v60 }
 0x1b4   :  { %v349_v63 = vpop.eup %348 }
 0x1b5   :  { %v351_v1 = vpop.eup %350  ;;  %v242_v3 = vmul.f32 %v349_v63, %v230_v62  ;;  %263 = vst [vmem:[#allocation8] sm:$0xff] %v259_v61 }
 0x1b6   :  { %v353_v4 = vpop.eup %352  ;;  %v244_v5 = vmul.f32 %v351_v1, %v232_v0 }
 0x1b7   :  { %v251_v6 = vmul.f32 %v296_v57, %v242_v3  ;;  %v243_v7 = vmul.f32 %v353_v4, %v231_v2 }
 0x1b8   :  { %v253_v8 = vmul.f32 %v296_v57, %v244_v5 }
 0x1b9   :  { %v260_v9 = vadd.f32 %v297_v59, %v251_v6  ;;  %v252_v10 = vmul.f32 %v296_v57, %v243_v7 }
 0x1ba   :  { %v262_v11 = vadd.f32 %v297_v59, %v253_v8 }
 0x1bb   :  { %264 = vst [vmem:[#allocation8 + $0x8] sm:$0xff] %v260_v9  ;;  %v261_v13 = vadd.f32 %v297_v59, %v252_v10 }
 0x1bc   :  { %266 = vst [vmem:[#allocation8 + $0x18] sm:$0xff] %v262_v11 }
 0x1bd   :  { %265 = vst [vmem:[#allocation8 + $0x10] sm:$0xff] %v261_v13 }
 0x1be   :  { %425 = shalt.err (!%p422_p5)
}
 0x1bf   :  { %s446_s29 = smov 128   ;;  %s447_s30 = smov 8  }
 0x1c0   :  { %278 = dma.vmem_to_hbm [thread:$0]  %s273_s2, 512, %s495_s3, [#allocation4], %s446_s29, %s446_s29, %s447_s30  }
 0x1c1   :  { %438 = dma.done.wait [#allocation4], 512  }
 0x1c2   :  { %439 = vsyncadd [#allocation4], 4294966784 }
 0x1c3   :  { %282 = vsyncpa [#allocation3], 1 }
 0x1c4   :  { %283 = vsyncpa [#allocation6], 1 }
 0x1c5   :  { %284 = vsyncpa [#allocation4], 1 }

</bundles_post_ra>
